<compile_context>
chip_gen: v7x
topology: tpu7x:2x2x1
jax: 0.10.0
libtpu: 0.0.40
codegen_flags: <defaults>
</compile_context>

<pallas_src>
import functools

import numpy as np
import jax
import jax.numpy as jnp
from jax.experimental import pallas as pl
from jax.experimental.pallas import tpu as pltpu


# ----------------------------- filter helpers -----------------------------

_FILTER_TABLE = {
    1: [1.0],
    2: [1.0, 1.0],
    3: [1.0, 2.0, 1.0],
    4: [1.0, 3.0, 3.0, 1.0],
    5: [1.0, 4.0, 6.0, 4.0, 1.0],
    6: [1.0, 5.0, 10.0, 10.0, 5.0, 1.0],
    7: [1.0, 6.0, 15.0, 20.0, 15.0, 6.0, 1.0],
}


def get_filter_1d(filt_size=3):
    a = np.asarray(_FILTER_TABLE[filt_size], dtype=np.float64)
    # (a/sum(a)) ⊗ (a/sum(a)) == (a ⊗ a) / sum(a ⊗ a)  (same as torch code)
    return (a / a.sum()).astype(np.float32)


def _blur_matrix(out_len, in_len, a_norm, stride):
    """Banded matrix M with M[i, i*stride + k] = a_norm[k] (conv + subsample)."""
    f = len(a_norm)
    m = np.zeros((out_len, in_len), dtype=np.float32)
    for i in range(out_len):
        for k in range(f):
            m[i, i * stride + k] += a_norm[k]
    return m


def _pad_select_matrix(n, pad_lo, pad_hi, pad_type):
    """(n+pad_lo+pad_hi, n) selector R such that R @ x == pad_1d(x)."""
    idx = np.arange(n)
    if pad_type in ("refl", "reflect"):
        mapped = np.pad(idx, (pad_lo, pad_hi), mode="reflect")
    elif pad_type in ("repl", "replicate"):
        mapped = np.pad(idx, (pad_lo, pad_hi), mode="edge")
    elif pad_type == "zero":
        mapped = np.pad(idx, (pad_lo, pad_hi), mode="constant", constant_values=-1)
    else:
        raise ValueError(f"Pad type [{pad_type}] not recognized")
    r = np.zeros((n + pad_lo + pad_hi, n), dtype=np.float32)
    for i, j in enumerate(mapped):
        if j >= 0:
            r[i, j] = 1.0
    return r


def _round_up(x, m):
    return ((x + m - 1) // m) * m


def _fold_blur_and_pad(n, pad_lo, pad_hi, pad_type, a_norm, stride, out_multiple):
    """Build (blur ∘ subsample ∘ pad) as one matrix acting on the UNPADDED axis.

    Returns (M_padded, n_out, n_out_padded) where M_padded is
    (n_out_padded, n): rows beyond n_out are zero (lane/sublane alignment
    padding that is sliced off by the wrapper).
    """
    f = len(a_norm)
    n_padded_in = n + pad_lo + pad_hi
    n_out = (n_padded_in - f) // stride + 1
    blur = _blur_matrix(n_out, n_padded_in, a_norm, stride)      # (n_out, n_pad_in)
    sel = _pad_select_matrix(n, pad_lo, pad_hi, pad_type)        # (n_pad_in, n)
    m = (blur @ sel).astype(np.float32)                          # (n_out, n)
    n_out_padded = _round_up(n_out, out_multiple)
    if n_out_padded != n_out:
        m = np.concatenate(
            [m, np.zeros((n_out_padded - n_out, n), dtype=np.float32)], axis=0)
    return m, n_out, n_out_padded


def _pad_hw(x, pad_w, pad_h, pad_type):
    """Reference-path padding only (NOT used by the Pallas hot path)."""
    widths = ((0, 0), (0, 0), pad_h, pad_w)
    if pad_type in ("refl", "reflect"):
        return jnp.pad(x, widths, mode="reflect")
    elif pad_type in ("repl", "replicate"):
        return jnp.pad(x, widths, mode="edge")
    elif pad_type == "zero":
        return jnp.pad(x, widths, mode="constant")
    else:
        raise ValueError(f"Pad type [{pad_type}] not recognized")


# ------------------------------ Pallas kernel ------------------------------

def _downsample_kernel(x_ref, ah_ref, awt_ref, o_ref, *, bc):
    # x_ref  : (BC, H, W)        BC unpadded (n, c) images
    # ah_ref : (Ho_pad, H)       row blur+subsample (pad folded in)
    # awt_ref: (W, Wo_pad)       col blur+subsample, pre-transposed on host
    # o_ref  : (BC, Ho_pad, Wo_pad)
    ah = ah_ref[...]
    awt = awt_ref[...]
    for b in range(bc):  # small static unroll; each iter = 2 MXU matmuls
        t = jnp.dot(x_ref[b], awt, preferred_element_type=jnp.float32)   # (H, Wo_pad)
        o_ref[b] = jnp.dot(ah, t, preferred_element_type=jnp.float32).astype(o_ref.dtype)


def _pick_bc(nc, in_elems, out_elems, dtype_bytes=4, vmem_budget=24 << 20):
    """Images per grid step: large DMAs, but safe on v7x's 64 MiB VMEM and
    keeping >= 2 grid steps so both v7x TensorCores get work."""
    per_img = 2 * (in_elems + out_elems) * dtype_bytes   # double-buffered in+out
    cap = max(1, int(vmem_budget // max(per_img, 1)))
    bc = max(1, min(nc, cap, 16))
    if nc >= 2 and nc // bc < 2:
        bc = max(1, nc // 2)
    while nc % bc != 0:       # exact tiling of the flattened batch
        bc -= 1
    return bc


def downsample(x, *, pad_type="reflect", filt_size=3, stride=2, pad_off=0):
    """JAX/Pallas equivalent of Downsample.forward. x is NCHW float32."""
    N, C, H, W = x.shape

    p_lo = int(1.0 * (filt_size - 1) / 2) + pad_off
    p_hi = int(np.ceil(1.0 * (filt_size - 1) / 2)) + pad_off

    a_norm = get_filter_1d(filt_size)

    # Fold padding into the blur matrices; pad output dims for dense stores.
    ah_np, Ho, Ho_pad = _fold_blur_and_pad(
        H, p_lo, p_hi, pad_type, a_norm, stride, out_multiple=8)
    aw_np, Wo, Wo_pad = _fold_blur_and_pad(
        W, p_lo, p_hi, pad_type, a_norm, stride, out_multiple=128)

    ah = jnp.asarray(ah_np)            # (Ho_pad, H)
    awt = jnp.asarray(aw_np.T.copy())  # (W, Wo_pad)  pre-transposed constant

    NC = N * C
    x_flat = x.reshape(NC, H, W)

    bc = _pick_bc(NC, H * W, Ho_pad * Wo_pad)
    grid = NC // bc

    kernel = functools.partial(_downsample_kernel, bc=bc)

    # Effective (tap-count) FLOPs of the separable blur, not dense-matmul FLOPs.
    flops = 2 * NC * filt_size * (Ho * W + Ho * Wo)
    bytes_accessed = 4 * (NC * (H * W + Ho_pad * Wo_pad) + Ho_pad * H + W * Wo_pad)

    out_flat = pl.pallas_call(
        kernel,
        out_shape=jax.ShapeDtypeStruct((NC, Ho_pad, Wo_pad), x.dtype),
        grid_spec=pltpu.PrefetchScalarGridSpec(
            num_scalar_prefetch=0,
            grid=(grid,),
            in_specs=[
                pl.BlockSpec((bc, H, W), lambda g: (g, 0, 0)),
                pl.BlockSpec((Ho_pad, H), lambda g: (0, 0)),
                pl.BlockSpec((W, Wo_pad), lambda g: (0, 0)),
            ],
            out_specs=pl.BlockSpec((bc, Ho_pad, Wo_pad), lambda g: (g, 0, 0)),
        ),
        compiler_params=pltpu.CompilerParams(
            dimension_semantics=("parallel",),
        ),
        cost_estimate=pl.CostEstimate(
            flops=flops, transcendentals=0, bytes_accessed=bytes_accessed),
    )(x_flat, ah, awt)

    # Strip alignment padding and restore NCHW.
    return out_flat[:, :Ho, :Wo].reshape(N, C, Ho, Wo)


# ------------------------- reference (pure JAX) ----------------------------

def downsample_ref(x, *, pad_type="reflect", filt_size=3, stride=2, pad_off=0):
    N, C, H, W = x.shape
    p_lo = int(1.0 * (filt_size - 1) / 2) + pad_off
    p_hi = int(np.ceil(1.0 * (filt_size - 1) / 2)) + pad_off
    pad_w = (p_lo, p_hi)
    pad_h = (p_lo, p_hi)
    if sum(pad_w) + sum(pad_h) > 0:
        xp = _pad_hw(x, pad_w, pad_h, pad_type)
    else:
        xp = x
    Hp, Wp = xp.shape[2], xp.shape[3]
    Ho = (Hp - filt_size) // stride + 1
    Wo = (Wp - filt_size) // stride + 1
    a = get_filter_1d(filt_size)
    w2 = a[:, None] * a[None, :]
    out = jnp.zeros((N, C, Ho, Wo), dtype=jnp.float32)
    for kh in range(filt_size):
        for kw in range(filt_size):
            sl = xp[:, :,
                    kh:kh + stride * (Ho - 1) + 1:stride,
                    kw:kw + stride * (Wo - 1) + 1:stride]
            out = out + float(w2[kh, kw]) * sl
    return out.astype(x.dtype)


if __name__ == "__main__":
    key = jax.random.PRNGKey(0)

    # Primary test: reflect pad, filt_size=3, stride=2 (the ResnetGenerator config).
    N, C, H, W = 2, 4, 16, 16
    x = jax.random.normal(key, (N, C, H, W), dtype=jnp.float32)

    out = downsample(x, pad_type="reflect", filt_size=3, stride=2, pad_off=0)
    out = jax.block_until_ready(out)
    ref = jax.block_until_ready(downsample_ref(x, pad_type="reflect", filt_size=3))
    assert out.shape == (N, C, 8, 8), out.shape
    np.testing.assert_allclose(np.asarray(out), np.asarray(ref), rtol=1e-5, atol=1e-5)

    # Secondary test: replicate pad, filt_size=4, odd spatial sizes.
    key2 = jax.random.PRNGKey(0)
    x2 = jax.random.normal(key2, (1, 3, 10, 12), dtype=jnp.float32)
    out2 = jax.block_until_ready(
        downsample(x2, pad_type="replicate", filt_size=4, stride=2, pad_off=0))
    ref2 = jax.block_until_ready(
        downsample_ref(x2, pad_type="replicate", filt_size=4, stride=2, pad_off=0))
    np.testing.assert_allclose(np.asarray(out2), np.asarray(ref2), rtol=1e-5, atol=1e-5)

    print("KERNEL_OK")
</pallas_src>

<mosaic_0001>
module attributes {stable_mosaic.version = 11 : i64} {
  func.func @_downsample_kernel(%arg0: i32, %arg1: memref<4x16x16xf32, #tpu.memory_space<vmem>>, %arg2: memref<8x16xf32, #tpu.memory_space<vmem>>, %arg3: memref<16x128xf32, #tpu.memory_space<vmem>>, %arg4: memref<4x8x128xf32, #tpu.memory_space<vmem>>) attributes {dimension_semantics = [#tpu.dimension_semantics<parallel>], iteration_bounds = array<i64: 2>, scalar_prefetch = 0 : i64, scratch_operands = 0 : i64, tpu.core_type = #tpu.core_type<tc>, window_params = [{transform_indices = @transform_0, window_bounds = array<i64: 4, 16, 16>}, {pipeline_mode = #tpu.pipeline_mode<synchronous>, transform_indices = @transform_1, window_bounds = array<i64: 8, 16>}, {pipeline_mode = #tpu.pipeline_mode<synchronous>, transform_indices = @transform_2, window_bounds = array<i64: 16, 128>}, {transform_indices = @transform_3, window_bounds = array<i64: 4, 8, 128>}]} {
    %c0 = arith.constant 0 : index
    %c0_0 = arith.constant 0 : index
    %0 = vector.load %arg2[%c0, %c0_0] : memref<8x16xf32, #tpu.memory_space<vmem>>, vector<8x16xf32>
    %c0_1 = arith.constant 0 : index
    %c0_2 = arith.constant 0 : index
    %1 = vector.load %arg3[%c0_1, %c0_2] : memref<16x128xf32, #tpu.memory_space<vmem>>, vector<16x128xf32>
    %c0_3 = arith.constant 0 : index
    %c0_4 = arith.constant 0 : index
    %c0_5 = arith.constant 0 : index
    %2 = vector.load %arg1[%c0_3, %c0_4, %c0_5] : memref<4x16x16xf32, #tpu.memory_space<vmem>>, vector<1x16x16xf32>
    %3 = vector.shape_cast %2 : vector<1x16x16xf32> to vector<16x16xf32>
    %cst = arith.constant dense<0.000000e+00> : vector<16x128xf32>
    %4 = tpu.matmul %3, %1, %cst {dimension_numbers = #tpu.dot_dimension_numbers<[1], [0], [0], [1], [0, 0, 1, 1], [], []>} : vector<16x16xf32>, vector<16x128xf32>, vector<16x128xf32> -> vector<16x128xf32>
    %cst_6 = arith.constant dense<0.000000e+00> : vector<8x128xf32>
    %5 = tpu.matmul %0, %4, %cst_6 {dimension_numbers = #tpu.dot_dimension_numbers<[1], [0], [0], [1], [0, 0, 1, 1], [], []>} : vector<8x16xf32>, vector<16x128xf32>, vector<8x128xf32> -> vector<8x128xf32>
    %c0_7 = arith.constant 0 : index
    %c0_8 = arith.constant 0 : index
    %c0_9 = arith.constant 0 : index
    %6 = vector.load %arg4[%c0_7, %c0_8, %c0_9] : memref<4x8x128xf32, #tpu.memory_space<vmem>>, vector<1x8x128xf32>
    %7 = vector.shape_cast %6 : vector<1x8x128xf32> to vector<8x128xf32>
    %8 = vector.shape_cast %5 : vector<8x128xf32> to vector<1x8x128xf32>
    tpu.vector_store %arg4[%c0_7, %c0_8, %c0_9], %8 {strides = array<i32>} : memref<4x8x128xf32, #tpu.memory_space<vmem>>, vector<1x8x128xf32>,
    %c1 = arith.constant 1 : index
    %c0_10 = arith.constant 0 : index
    %c0_11 = arith.constant 0 : index
    %9 = vector.load %arg1[%c1, %c0_10, %c0_11] : memref<4x16x16xf32, #tpu.memory_space<vmem>>, vector<1x16x16xf32>
    %10 = vector.shape_cast %9 : vector<1x16x16xf32> to vector<16x16xf32>
    %cst_12 = arith.constant dense<0.000000e+00> : vector<16x128xf32>
    %11 = tpu.matmul %10, %1, %cst_12 {dimension_numbers = #tpu.dot_dimension_numbers<[1], [0], [0], [1], [0, 0, 1, 1], [], []>} : vector<16x16xf32>, vector<16x128xf32>, vector<16x128xf32> -> vector<16x128xf32>
    %cst_13 = arith.constant dense<0.000000e+00> : vector<8x128xf32>
    %12 = tpu.matmul %0, %11, %cst_13 {dimension_numbers = #tpu.dot_dimension_numbers<[1], [0], [0], [1], [0, 0, 1, 1], [], []>} : vector<8x16xf32>, vector<16x128xf32>, vector<8x128xf32> -> vector<8x128xf32>
    %c1_14 = arith.constant 1 : index
    %c0_15 = arith.constant 0 : index
    %c0_16 = arith.constant 0 : index
    %13 = vector.load %arg4[%c1_14, %c0_15, %c0_16] : memref<4x8x128xf32, #tpu.memory_space<vmem>>, vector<1x8x128xf32>
    %14 = vector.shape_cast %13 : vector<1x8x128xf32> to vector<8x128xf32>
    %15 = vector.shape_cast %12 : vector<8x128xf32> to vector<1x8x128xf32>
    tpu.vector_store %arg4[%c1_14, %c0_15, %c0_16], %15 {strides = array<i32>} : memref<4x8x128xf32, #tpu.memory_space<vmem>>, vector<1x8x128xf32>,
    %c2 = arith.constant 2 : index
    %c0_17 = arith.constant 0 : index
    %c0_18 = arith.constant 0 : index
    %16 = vector.load %arg1[%c2, %c0_17, %c0_18] : memref<4x16x16xf32, #tpu.memory_space<vmem>>, vector<1x16x16xf32>
    %17 = vector.shape_cast %16 : vector<1x16x16xf32> to vector<16x16xf32>
    %cst_19 = arith.constant dense<0.000000e+00> : vector<16x128xf32>
    %18 = tpu.matmul %17, %1, %cst_19 {dimension_numbers = #tpu.dot_dimension_numbers<[1], [0], [0], [1], [0, 0, 1, 1], [], []>} : vector<16x16xf32>, vector<16x128xf32>, vector<16x128xf32> -> vector<16x128xf32>
    %cst_20 = arith.constant dense<0.000000e+00> : vector<8x128xf32>
    %19 = tpu.matmul %0, %18, %cst_20 {dimension_numbers = #tpu.dot_dimension_numbers<[1], [0], [0], [1], [0, 0, 1, 1], [], []>} : vector<8x16xf32>, vector<16x128xf32>, vector<8x128xf32> -> vector<8x128xf32>
    %c2_21 = arith.constant 2 : index
    %c0_22 = arith.constant 0 : index
    %c0_23 = arith.constant 0 : index
    %20 = vector.load %arg4[%c2_21, %c0_22, %c0_23] : memref<4x8x128xf32, #tpu.memory_space<vmem>>, vector<1x8x128xf32>
    %21 = vector.shape_cast %20 : vector<1x8x128xf32> to vector<8x128xf32>
    %22 = vector.shape_cast %19 : vector<8x128xf32> to vector<1x8x128xf32>
    tpu.vector_store %arg4[%c2_21, %c0_22, %c0_23], %22 {strides = array<i32>} : memref<4x8x128xf32, #tpu.memory_space<vmem>>, vector<1x8x128xf32>,
    %c3 = arith.constant 3 : index
    %c0_24 = arith.constant 0 : index
    %c0_25 = arith.constant 0 : index
    %23 = vector.load %arg1[%c3, %c0_24, %c0_25] : memref<4x16x16xf32, #tpu.memory_space<vmem>>, vector<1x16x16xf32>
    %24 = vector.shape_cast %23 : vector<1x16x16xf32> to vector<16x16xf32>
    %cst_26 = arith.constant dense<0.000000e+00> : vector<16x128xf32>
    %25 = tpu.matmul %24, %1, %cst_26 {dimension_numbers = #tpu.dot_dimension_numbers<[1], [0], [0], [1], [0, 0, 1, 1], [], []>} : vector<16x16xf32>, vector<16x128xf32>, vector<16x128xf32> -> vector<16x128xf32>
    %cst_27 = arith.constant dense<0.000000e+00> : vector<8x128xf32>
    %26 = tpu.matmul %0, %25, %cst_27 {dimension_numbers = #tpu.dot_dimension_numbers<[1], [0], [0], [1], [0, 0, 1, 1], [], []>} : vector<8x16xf32>, vector<16x128xf32>, vector<8x128xf32> -> vector<8x128xf32>
    %c3_28 = arith.constant 3 : index
    %c0_29 = arith.constant 0 : index
    %c0_30 = arith.constant 0 : index
    %27 = vector.load %arg4[%c3_28, %c0_29, %c0_30] : memref<4x8x128xf32, #tpu.memory_space<vmem>>, vector<1x8x128xf32>
    %28 = vector.shape_cast %27 : vector<1x8x128xf32> to vector<8x128xf32>
    %29 = vector.shape_cast %26 : vector<8x128xf32> to vector<1x8x128xf32>
    tpu.vector_store %arg4[%c3_28, %c0_29, %c0_30], %29 {strides = array<i32>} : memref<4x8x128xf32, #tpu.memory_space<vmem>>, vector<1x8x128xf32>,
    return
  }
  func.func @transform_0(%arg0: i32) -> (i32, i32, i32) {
    %c0_i32 = arith.constant 0 : i32
    %c0_i32_0 = arith.constant 0 : i32
    %c0_i32_1 = arith.constant 0 : i32
    return %arg0, %c0_i32, %c0_i32_0 : i32, i32, i32
  }
  func.func @transform_1(%arg0: i32) -> (i32, i32) {
    %c0_i32 = arith.constant 0 : i32
    %c0_i32_0 = arith.constant 0 : i32
    %c0_i32_1 = arith.constant 0 : i32
    return %c0_i32, %c0_i32_0 : i32, i32
  }
  func.func @transform_2(%arg0: i32) -> (i32, i32) {
    %c0_i32 = arith.constant 0 : i32
    %c0_i32_0 = arith.constant 0 : i32
    %c0_i32_1 = arith.constant 0 : i32
    return %c0_i32, %c0_i32_0 : i32, i32
  }
  func.func @transform_3(%arg0: i32) -> (i32, i32, i32) {
    %c0_i32 = arith.constant 0 : i32
    %c0_i32_0 = arith.constant 0 : i32
    %c0_i32_1 = arith.constant 0 : i32
    return %arg0, %c0_i32, %c0_i32_0 : i32, i32, i32
  }
}

</mosaic_0001>

<bundles_post_ra>
// kernel: tpu_custom_call.1
= control target key start
LH: loop header
LB: loop body
LE: loop exit
PB: predicated region body
PF: predicated region fallthrough
CT: control target
= control target key end

     0   :  { %8 = vsyncpa [#allocation3], 0  ;;  %s1636_s0 = inlined_call_operand.hbm [shape: f32[8,16,16], index: 0, kind: input, shape index: {}]   ;;  %s1637_s1 = inlined_call_operand.hbm [shape: f32[8,16], index: 1, kind: input, shape index: {}]   ;;  %s1638_s2 = inlined_call_operand.hbm [shape: f32[16,128], index: 2, kind: input, shape index: {}]   ;;  %s1639_s3 = inlined_call_operand.hbm [shape: f32[8,8,128], index: 3, kind: output, shape index: {}]  }
   0x1   :  { %10 = vsyncpa [#allocation3 + $0x1], 0 }
   0x2   :  { %11 = vsyncpa [#allocation6], 0 }
   0x3   :  { %12 = vsyncpa [#allocation4], 0 }
   0x4   :  { %14 = vsyncpa [#allocation4 + $0x1], 0  ;;  %s1372_s12 = smov 0   ;;  %s1374_s13 = smov 0  }
   0x5   :  { %s1376_s14 = smov 0   ;;  %s1378_s15 = smov 0  }
   0x6 LB: > { %s1393_s16 = sadd.s32 4294967295, %s1339_s15   ;;  %s954_s17 = sadd.s32 4294967294, %s1339_s15   ;;  %s1339_s15 = sphi %s1378_s15, %s1664_s15   ;;  %s1335_s14 = sphi %s1376_s14, %s1663_s14   ;;  %s1331_s13 = sphi %s1374_s13, %s1662_s13   ;;  %s1327_s12 = sphi %s1372_s12, %s1661_s12  }
   0x7   : > { %s1397_s18 = sadd.s32 1, %s1339_s15   ;;  %s27_s19 = sadd.s32 1, %s1335_s14 }
   0x8   : > { %s24_s20 = ssub.s32 %s1339_s15, %s1397_s18  ;;  %p34_p0 = scmp.ne.s32.totalorder %s1335_s14, %s1331_s13 }
   0x9   : > { %p25_p1 = scmp.eq.s32.totalorder %s24_s20, 0  ;;  %p35_p2 = scmp.eq.s32.totalorder %s1339_s15, 0 }
   0xa   : > { %p40_p3 = scmp.ne.s32.totalorder %s1331_s13, %s1327_s12  ;;  %p1640_p4 = scmp.eq.s32.totalorder %s1393_s16, 0 }
   0xb   : > { %s1409_s21 = scalar_select %p25_p1, %s1335_s14, %s27_s19  }
   0xc   : > { %p1411_p5 = por %p35_p2, %p34_p0  ;;  %p1417_p6 = por %p1640_p4, %p40_p3 }
   0xd   : > { %p106_p7 = scmp.eq.s32.totalorder %s1393_s16, 1  ;;  %p112_p8 = scmp.eq.s32.totalorder %s954_s17, 1 }
   0xe   : > { %s1646_s23 = scalar_select %p1417_p6, 1, 0 }
   0xf   : > { %p955_p9 = scmp.ge.s32.totalorder %s1339_s15, 1  ;;  %p119_p10 = scmp.lt.s32.totalorder %s1339_s15, 3 }
  0x10   : > { %p1424_p11 = por %p106_p7, %p34_p0  ;;  %p1428_p12 = por %p112_p8, %p40_p3 }
  0x11   : > { %p1432_p13 = pnand %p955_p9, %p119_p10  ;;  %s1341_s27 = smov [#allocation5]  }
  0x12   : > { %s1647_s24 = scalar_select %p1424_p11, 1, 0 }
  0x13   : > { %s1648_s25 = scalar_select %p1428_p12, 1, 0 }
  0x14   : > { %s1649_s26 = scalar_select %p1432_p13, 1, 0 }
  0x15   : > { %p1121_p2 = pneg %p1432_p13  ;;  %s132_s28 = sshll.u32 %s1341_s27, 4  ;;  %s133_s28 = int_to_ptr.vmem [resolvable:$true] %s132_s28 }
  0x16   : > { %p1138_p4 = scmp.lt.s32.totalorder %s1339_s15, 2  ;;  %p1650_p0 = scmp.eq.s32.totalorder %s1393_s16, 0 }
  0x17   : > { %s1342_s4 = smov [#allocation7]   ;;  %s1183_s8 = scalar_lea.hbm %s1637_s1, 128 }
  0x18   : > { %p1442_p7 = pnand %p1121_p2, %p1650_p0  ;;  %p1448_p3 = pnand %p1138_p4, %p1411_p5 }
  0x19   : > { %s142_s5 = sshll.u32 %s1342_s4, 4  ;;  %p1184_p8 = scmp.ne.s32.totalorder %s1637_s1, %s1183_s8  ;;  %s1452_s5 = int_to_ptr.vmem [resolvable:$true] %s142_s5 }
  0x1a   : > { %s1652_s30 = scalar_select %p1448_p3, 1, 0 }
  0x1b   : > { %p1185_p9 = pneg %p1442_p7  ;;  %p1190_p10 = scmp.lt.u32.totalorder %s1183_s8, %s1637_s1 }
  0x1d   : > { %p1186_p4 = pnand %p1185_p9, %p1184_p8 }
  0x1f   : > { %p1187_p5 = pneg %p1186_p4 }
  0x21   : > { %p1192_p2 = pnand %p1190_p10, %p1187_p5 }
  0x23   : > { %1195 = shalt.err (!%p1192_p2)
}
  0x24   : > { %s1196_s19 = scalar_lea.vmem %s133_s28, 128  ;;  %p1204_p11 = scmp.lt.s32.totalorder %s133_s28, %s133_s28 }
  0x25   : > { %p1197_p0 = scmp.ne.s32.totalorder %s133_s28, %s1196_s19  ;;  %p1205_p6 = scmp.lt.s32.totalorder %s1196_s19, %s1196_s19 }
  0x27   : > { %p1199_p1 = pnand %p1197_p0, %p1185_p9  ;;  %p1206_p13 = por %p1205_p6, %p1204_p11 }
  0x29   : > { %p1200_p12 = pneg %p1199_p1 }
  0x2b   : > { %p1207_p3 = pnand %p1206_p13, %p1200_p12 }
  0x2d   : > { %1210 = shalt.err (!%p1207_p3)
}
  0x2e   : > { %1124 = dma.hbm_to_vmem [thread:$0]  (!%p1442_p7), %s1637_s1, 128, %s133_s28, [#allocation6]  }
  0x2f   : > { %s156_s27 = sand.u32 1, %s1335_s14   ;;  %s1211_s7 = scalar_lea.hbm %s1638_s2, 256 }
  0x30   : > { %p1212_p1 = scmp.ne.s32.totalorder %s1638_s2, %s1211_s7  ;;  %p1218_p12 = scmp.lt.u32.totalorder %s1211_s7, %s1638_s2 }
  0x32   : > { %p1214_p6 = pnand %p1212_p1, %p1185_p9 }
  0x34   : > { %p1215_p11 = pneg %p1214_p6 }
  0x36   : > { %p1220_p13 = pnand %p1218_p12, %p1215_p11 }
  0x38   : > { %1223 = shalt.err (!%p1220_p13)
}
  0x39   : > { %s1224_s28 = scalar_lea.vmem %s1452_s5, 256  ;;  %p1232_p5 = scmp.lt.s32.totalorder %s1452_s5, %s1452_s5 }
  0x3a   : > { %p1225_p3 = scmp.ne.s32.totalorder %s1452_s5, %s1224_s28  ;;  %p1233_p10 = scmp.lt.s32.totalorder %s1224_s28, %s1224_s28 }
  0x3c   : > { %p1227_p8 = pnand %p1225_p3, %p1185_p9  ;;  %p1234_p2 = por %p1233_p10, %p1232_p5 }
  0x3e   : > { %p1228_p4 = pneg %p1227_p8 }
  0x40   : > { %p1235_p0 = pnand %p1234_p2, %p1228_p4 }
  0x42   : > { %1238 = shalt.err (!%p1235_p0)
}
  0x43   : > { %s1343_s17 = smov 128   ;;  %s1344_s19 = smov 8  }
  0x44   : > { %1127 = dma.hbm_to_vmem [thread:$0]  (!%p1442_p7), %s1638_s2, 256, %s1452_s5, [#allocation6], %s1343_s17, %s1343_s17, %s1344_s19  }
  0x45   : > { %s959_s4 = sshll.u32 %s156_s27, 6  ;;  %s995_s6 = sshll.u32 %s1339_s15, 10 }
  0x46   : > { %s1509_s9 = scalar_lea.hbm %s1636_s0, %s995_s6  ;;  %s160_s10 = scalar_lea.vmem [#allocation2], %s959_s4 }
  0x47   : > { %s168_s29 = sshll.u32 %s160_s10, 4  ;;  %s1513_s11 = scalar_lea.sflag [#allocation3], %s156_s27  ;;  %s1511_s29 = int_to_ptr.vmem [resolvable:$true] %s168_s29 }
  0x48   : > { %s1239_s28 = scalar_lea.hbm %s1509_s9, 1024  ;;  %p1653_p7 = scmp.ne.s32.totalorder %s1652_s30, 0 }
  0x49   : > { %p1240_p9 = scmp.ne.s32.totalorder %s1509_s9, %s1239_s28  ;;  %s1244_s22 = scalar_lea.hbm %s1636_s0, 2048 }
  0x4a   : > { %p1241_p1 = pneg %p1653_p7  ;;  %p1245_p12 = scmp.lt.u32.totalorder %s1509_s9, %s1636_s0 }
  0x4b   : > { %p1246_p13 = scmp.lt.u32.totalorder %s1244_s22, %s1239_s28  ;;  %p1248_p8 = scmp.lt.u32.totalorder %s1239_s28, %s1509_s9 }
  0x4c   : > { %p1242_p6 = pnand %p1241_p1, %p1240_p9 }
  0x4d   : > { %p1247_p3 = por %p1246_p13, %p1245_p12 }
  0x4e   : > { %p1243_p11 = pneg %p1242_p6 }
  0x4f   : > { %p1249_p4 = por %p1248_p8, %p1247_p3 }
  0x51   : > { %p1250_p5 = pnand %p1249_p4, %p1243_p11 }
  0x53   : > { %1253 = shalt.err (!%p1250_p5)
}
  0x54   : > { %s1254_s27 = scalar_lea.vmem %s1511_s29, 1024  ;;  %s1345_s4 = smov [#allocation2]  }
  0x55   : > { %p1255_p10 = scmp.ne.s32.totalorder %s1511_s29, %s1254_s27  ;;  %s1259_s8 = sshll.u32 %s1345_s4, 4  ;;  %s1260_s8 = int_to_ptr.vmem [resolvable:$false] %s1259_s8 }
  0x56   : > { %s1261_s10 = scalar_lea.vmem %s1260_s8, 2048  ;;  %p1262_p9 = scmp.lt.s32.totalorder %s1511_s29, %s1260_s8 }
  0x57   : > { %p1257_p2 = pnand %p1255_p10, %p1241_p1  ;;  %p1263_p6 = scmp.lt.s32.totalorder %s1261_s10, %s1254_s27 }
  0x59   : > { %p1258_p0 = pneg %p1257_p2  ;;  %p1264_p12 = por %p1263_p6, %p1262_p9 }
  0x5b   : > { %p1265_p13 = pnand %p1264_p12, %p1258_p0 }
  0x5d   : > { %1268 = shalt.err (!%p1265_p13)
}
  0x5e   : > { %1131 = dma.hbm_to_vmem [thread:$0]  (!%p1653_p7), %s1509_s9, 1024, %s1511_s29, %s1513_s11, %s1343_s17, %s1343_s17, %s1344_s19  }
  0x5f   : > { %p1654_p1 = scmp.ne.s32.totalorder %s1649_s26, 0 }
  0x60   : > { %s1547_s28 = sand.u32 (!%p1654_p1), 1, %s1331_s13   ;;  %p1655_p11 = scmp.ne.s32.totalorder (!%p1654_p1), %s1646_s23, 0 }
  0x61   : > { %180 = sbr.rel (%p1654_p1) target bundleno = 572 (0x23c), region = 32  ;;  %s964_s5 = sshll.u32 (!%p1654_p1), %s1547_s28, 6 }
  0x62   : > { %s183_s20 = scalar_lea.sflag (!%p1654_p1), [#allocation3], %s1547_s28  ;;  %s1551_s22 = scalar_lea.vmem (!%p1654_p1), [#allocation2], %s964_s5 }
  0x68   : > { %1314 = dma.done.wait (%p1655_p11), %s183_s20, 1024  }
  0x69   : > { %1316 = vsyncadd (%p1655_p11), %s183_s20, 4294966272  ;;  %p1656_p7 = scmp.eq.s32.totalorder %s1393_s16, 0 }
  0x6b   : > { %1318 = dma.done.wait (%p1656_p7), [#allocation6], 384   ;;  %p1657_p3 = pmov %p1656_p7 }
  0x6c   : > { %vm224_vm0 = vcmask 130048   ;;  %v220_v0 = vld [vmem:[#allocation7] sm:$0xff]  ;;  %v221_v1 = vld [vmem:[#allocation7 + $0x8] sm:$0xff]  ;;  %v222_v2 = vld [vmem:[%s1551_s22] sm:$0xff]  ;;  %v1346_v11 = vmov 0.0|0.0   ;;  %vm1347_vm1 = vmmov 0  }
  0x6d   : > { %1320 = vsyncadd (%p1657_p3), [#allocation6], 4294966912  ;;  %v1081_v3 = vpack.c.bf16 %v221_v1, %v220_v0  ;;  %1029 = vmatprep.mubr.msk.f32.mxu0 %vm224_vm0, %v222_v2  ;;  %v223_v4 = vld [vmem:[%s1551_s22 + $0x8] sm:$0xff]  ;;  %v971_v5 = vld [vmem:[%s1551_s22 + $0x10] sm:$0xff]  ;;  %1085 = vmatprep.subr.bf16.mxu1 %v1346_v11  ;;  %v1348_v12 = vmov 0.0   ;;  %s967_s23 = sshll.u32 %s1547_s28, 5 }
  0x6e   : > { %v972_v6 = vld [vmem:[%s1551_s22 + $0x18] sm:$0xff]  ;;  %v977_v7 = vld [vmem:[%s1551_s22 + $0x20] sm:$0xff]  ;;  %v978_v8 = vld [vmem:[%s1551_s22 + $0x28] sm:$0xff]  ;;  %1036 = vmatprep.mubr.msk.f32.mxu1 %vm1347_vm1, %v1348_v12  ;;  %s216_s26 = scalar_lea.vmem [#allocation8], %s967_s23  ;;  %s996_s17 = sshll.u32 %s1393_s16, 9 }
  0x6f   : > { %1082 = vmatprep.subr.bf16.mxu0 %v1081_v3  ;;  %v983_v9 = vld [vmem:[%s1551_s22 + $0x30] sm:$0xff]  ;;  %v984_v10 = vld [vmem:[%s1551_s22 + $0x38] sm:$0xff]  ;;  %v219_v17 = vld [vmem:[#allocation5] sm:$0xff]  ;;  %s862_s30 = sshll.u32 %s216_s26, 4  ;;  %s1592_s29 = scalar_lea.hbm %s1639_s3, %s996_s17  ;;  %s1587_s30 = int_to_ptr.vmem [resolvable:$true] %s862_s30 }
  0x70   : > { %1084 = vmatpush3.bf16.msra.mxu0 %v1081_v3  ;;  %s849_s11 = scalar_lea.sflag [#allocation4], %s1547_s28  ;;  %s1269_s6 = scalar_lea.vmem %s1587_s30, 512 }
  0x71   : > { %1089 = vmatprep.subr.bf16.mxu0 %v1081_v3  ;;  %p1270_p8 = scmp.ne.s32.totalorder %s1587_s30, %s1269_s6  ;;  %p1658_p4 = scmp.ne.s32.totalorder %s1647_s24, 0 }
  0x72   : > { %s1349_s16 = smov [#allocation8]  }
  0x73   : > { %1030 = vmatmul.mubr.msk.f32.vlgmr.msra.gmra.mrb[0].mxu0 %vm224_vm0, %v223_v4  ;;  %p1271_p5 = pnand %p1270_p8, %p1658_p4  ;;  %s1273_s7 = sshll.u32 %s1349_s16, 4  ;;  %s1274_s7 = int_to_ptr.vmem [resolvable:$false] %s1273_s7 }
  0x74   : > { %1091 = vmatpush3.bf16.msra.mxu0 %v1081_v3  ;;  %1043 = vmatprep.mubr.msk.f32.mxu0 %vm224_vm0, %v971_v5  ;;  %s1275_s27 = scalar_lea.vmem %s1274_s7, 1024  ;;  %p1276_p2 = scmp.lt.s32.totalorder %s1587_s30, %s1274_s7 }
  0x75   : > { %1096 = vmatprep.subr.bf16.mxu0 %v1081_v3  ;;  %p1272_p10 = pneg %p1271_p5  ;;  %p1277_p0 = scmp.lt.s32.totalorder %s1275_s27, %s1269_s6 }
  0x77   : > { %1044 = vmatmul.mubr.msk.f32.vlgmr.msra.gmra.mrb[2].mxu0 %vm224_vm0, %v972_v6  ;;  %p1278_p9 = por %p1277_p0, %p1276_p2 }
  0x78   : > { %1098 = vmatpush3.bf16.msra.mxu0 %v1081_v3  ;;  %1057 = vmatprep.mubr.msk.f32.mxu0 %vm224_vm0, %v977_v7 }
  0x79   : > { %1103 = vmatprep.subr.bf16.mxu0 %v1081_v3  ;;  %p1279_p6 = pnand %p1278_p9, %p1272_p10 }
  0x7b   : > { %1058 = vmatmul.mubr.msk.f32.vlgmr.msra.gmra.mrb[4].mxu0 %vm224_vm0, %v978_v8 }
  0x7c   : > { %1105 = vmatpush3.bf16.msra.mxu0 %v1081_v3  ;;  %1071 = vmatprep.mubr.msk.f32.mxu0 %vm224_vm0, %v983_v9 }
  0x7f   : > { %1072 = vmatmul.mubr.msk.f32.vlgmr.msra.gmra.mrb[6].mxu0 %vm224_vm0, %v984_v10 }
 0x146   : > { %v1031_v13 = vpop.f32.mrb[0].mxu0 }
 0x147   : > { %v297_v14 = vpop.f32.mrb[1].mxu0 }
 0x148   : > { %v1086_v15 = vpack.c.bf16 %v1031_v13, %v297_v14 }
 0x14a   : > { %1087 = vmatpush3.bf16.msra.mxu1 %v1086_v15  ;;  %v1045_v16 = vpop.f32.mrb[2].mxu0 }
 0x14b   : > { %v455_v18 = vpop.f32.mrb[3].mxu0  ;;  %1092 = vmatprep.subr.bf16.mxu1 %v1346_v11 }
 0x14c   : > { %v1093_v19 = vpack.c.bf16 %v1045_v16, %v455_v18 }
 0x14d   : > { %1037 = vmatmul.mubr.msk.f32.vlgmr.msra.gmra.mrb[0].mxu1 %vm224_vm0, %v219_v17 }
 0x14e   : > { %1094 = vmatpush3.bf16.msra.mxu1 %v1093_v19  ;;  %v1059_v20 = vpop.f32.mrb[4].mxu0  ;;  %1050 = vmatprep.mubr.msk.f32.mxu1 %vm1347_vm1, %v1348_v12 }
 0x14f   : > { %v611_v21 = vpop.f32.mrb[5].mxu0  ;;  %1099 = vmatprep.subr.bf16.mxu1 %v1346_v11 }
 0x150   : > { %v1100_v22 = vpack.c.bf16 %v1059_v20, %v611_v21 }
 0x151   : > { %1051 = vmatmul.mubr.msk.f32.vlgmr.msra.gmra.mrb[2].mxu1 %vm224_vm0, %v219_v17 }
 0x152   : > { %1101 = vmatpush3.bf16.msra.mxu1 %v1100_v22  ;;  %v1073_v23 = vpop.f32.mrb[6].mxu0  ;;  %1064 = vmatprep.mubr.msk.f32.mxu1 %vm1347_vm1, %v1348_v12 }
 0x153   : > { %v767_v24 = vpop.f32.mrb[7].mxu0  ;;  %1106 = vmatprep.subr.bf16.mxu1 %v1346_v11 }
 0x154   : > { %v1107_v25 = vpack.c.bf16 %v1073_v23, %v767_v24 }
 0x155   : > { %1065 = vmatmul.mubr.msk.f32.vlgmr.msra.gmra.mrb[4].mxu1 %vm224_vm0, %v219_v17 }
 0x156   : > { %1108 = vmatpush3.bf16.msra.mxu1 %v1107_v25  ;;  %1078 = vmatprep.mubr.msk.f32.mxu1 %vm1347_vm1, %v1348_v12 }
 0x159   : > { %1079 = vmatmul.mubr.msk.f32.vlgmr.msra.gmra.mrb[6].mxu1 %vm224_vm0, %v219_v17 }
 0x220   : > { %v375_v26 = vpop.f32.mrb[0].mxu1 }
 0x221   : > { %379 = vst [vmem:[%s216_s26] sm:$0xff] %v375_v26  ;;  %v1038_v27 = vpop.f32.mrb[1].mxu1 }
 0x224   : > { %v530_v28 = vpop.f32.mrb[2].mxu1 }
 0x225   : > { %976 = vst [vmem:[%s216_s26 + $0x8] sm:$0xff] %v530_v28  ;;  %v1052_v29 = vpop.f32.mrb[3].mxu1 }
 0x228   : > { %v686_v30 = vpop.f32.mrb[4].mxu1 }
 0x229   : > { %982 = vst [vmem:[%s216_s26 + $0x10] sm:$0xff] %v686_v30  ;;  %v1066_v31 = vpop.f32.mrb[5].mxu1 }
 0x22c   : > { %v842_v32 = vpop.f32.mrb[6].mxu1 }
 0x22d   : > { %988 = vst [vmem:[%s216_s26 + $0x18] sm:$0xff] %v842_v32  ;;  %v1080_v33 = vpop.f32.mrb[7].mxu1 }
 0x22e   : > { %1282 = shalt.err (!%p1279_p6)
}
 0x22f   : > { %s1283_s4 = scalar_lea.hbm %s1592_s29, 512  ;;  %s1287_s5 = scalar_lea.hbm %s1639_s3, 1024 }
 0x230   : > { %p1284_p12 = scmp.ne.s32.totalorder %s1592_s29, %s1283_s4  ;;  %p1288_p11 = scmp.lt.u32.totalorder %s1592_s29, %s1639_s3 }
 0x231   : > { %p1289_p7 = scmp.lt.u32.totalorder %s1287_s5, %s1283_s4  ;;  %p1291_p8 = scmp.lt.u32.totalorder %s1283_s4, %s1592_s29 }
 0x232   : > { %p1285_p13 = pnand %p1284_p12, %p1658_p4 }
 0x233   : > { %p1290_p3 = por %p1289_p7, %p1288_p11 }
 0x234   : > { %p1286_p1 = pneg %p1285_p13 }
 0x235   : > { %p1292_p5 = por %p1291_p8, %p1290_p3 }
 0x237   : > { %p1293_p10 = pnand %p1292_p5, %p1286_p1 }
 0x239   : > { %1296 = shalt.err (!%p1293_p10)
}
 0x23a   : > { %s1350_s23 = smov 128   ;;  %s1351_s26 = smov 8  }
 0x23b   : > { %1119 = dma.vmem_to_hbm [thread:$0]  (%p1658_p4), %s1587_s30, 512, %s1592_s29, %s849_s11, %s1350_s23, %s1350_s23, %s1351_s26  }
 0x23c PF: > { %s877_s17 = sand.u32 1, %s1327_s12   ;;  %p1659_p2 = scmp.ne.s32.totalorder %s1648_s25, 0 }
 0x23d   : > { %p1660_p0 = scmp.ge.s32.totalorder %s1339_s15, 2  ;;  %s878_s19 = scalar_lea.sflag [#allocation4], %s877_s17 }
 0x23f   : > { %p1133_p9 = pnand %p1660_p0, %p1659_p2 }
 0x241   : > { %1322 = dma.done.wait (!%p1133_p9), %s878_s19, 512  }
 0x242   : > { %1324 = vsyncadd (!%p1133_p9), %s878_s19, 4294966784  ;;  %p17_p6 = scmp.ge.s32.totalorder %s1397_s18, 4   ;;  %s1661_s12 = smov %s1331_s13 }
 0x243   : > { %s1662_s13 = smov %s1335_s14  ;;  %s1663_s14 = smov %s1409_s21 }
 0x244   : > { %s1664_s15 = smov %s1397_s18  ;;  %19 = sbr.rel (!%p17_p6) target bundleno = 6 (0x6), region = 91 }
 0x24b   :  { %883 = vsyncpa [#allocation3], 1 }
 0x24c   :  { %885 = vsyncpa [#allocation3 + $0x1], 1 }
 0x24d   :  { %886 = vsyncpa [#allocation6], 1 }
 0x24e   :  { %887 = vsyncpa [#allocation4], 1 }
 0x24f   :  { %889 = vsyncpa [#allocation4 + $0x1], 1 }

</bundles_post_ra>
